<compile_context>
chip_gen: v7x
topology: tpu7x:2x2x1
jax: 0.10.0
libtpu: 0.0.40
codegen_flags: <defaults>
</compile_context>

<pallas_src>
import math
from typing import NamedTuple

import jax
import jax.numpy as jnp
import numpy as np
from jax.experimental import pallas as pl
from jax.experimental.pallas import tpu as pltpu


def _round_up(a: int, b: int) -> int:
    return (a + b - 1) // b * b


def _default_tk(K: int) -> int:
    return min(512, _round_up(K, 128))


def _default_tn(N: int) -> int:
    n_aligned = _round_up(N, 128)
    tn = min(1024, n_aligned)
    # v7x has 2 TensorCores and `n` is the only "parallel" grid axis: make
    # sure there are >= 2 n-tiles whenever N is large enough to split.
    if n_aligned <= tn and n_aligned >= 512:
        tn = _round_up(n_aligned // 2, 256)
    return tn


class PreparedWeight(NamedTuple):
    """Expert weights relaid out once ([E, K_pad, N_pad], compute dtype)."""
    w_kn: jax.Array
    out_features: int
    in_features: int
    tk: int
    tn: int


def prepare_moe_weight(weight, *, tk=None, tn=None,
                       compute_dtype=jnp.bfloat16) -> PreparedWeight:
    """One-time relayout of [E, N, K] -> padded [E, K_pad, N_pad] compute-dtype.

    Call this at parameter-init / load time (not per forward call) so the
    transpose + pad + cast of the full expert-weight tensor is hoisted out of
    the kernel's per-call HBM traffic.
    """
    E, N, K = weight.shape
    tk = _default_tk(K) if tk is None else tk
    tn = _default_tn(N) if tn is None else tn
    K_pad = _round_up(K, tk)
    N_pad = _round_up(N, tn)
    w_kn = jnp.swapaxes(weight, 1, 2).astype(compute_dtype)   # [E, K, N]
    if (K_pad, N_pad) != (K, N):
        w_kn = jnp.pad(w_kn, ((0, 0), (0, K_pad - K), (0, N_pad - N)))
    return PreparedWeight(w_kn, N, K, tk, tn)


def _moe_gmm_kernel(offs_ref, gids_ref, mids_ref,   # scalar prefetch (SMEM)
                    x_ref, w_ref,                   # VMEM input tiles
                    o_ref,                          # VMEM output tile
                    acc_ref):                       # VMEM f32 accumulator
    t = pl.program_id(1)
    k = pl.program_id(2)

    t_prev = jnp.maximum(t - 1, 0)
    is_dup = ((t > 0)
              & (gids_ref[t] == gids_ref[t_prev])
              & (mids_ref[t] == mids_ref[t_prev]))

    @pl.when(jnp.logical_not(is_dup))
    def _():
        @pl.when(k == 0)
        def _():
            acc_ref[...] = jnp.zeros_like(acc_ref)

        # (tm, tk) @ (tk, tn) on the MXU: bf16 operands, f32 accumulation.
        acc_ref[...] += jnp.dot(x_ref[...], w_ref[...],
                                preferred_element_type=jnp.float32)

        @pl.when(k == pl.num_programs(2) - 1)
        def _():
            tm = o_ref.shape[0]
            g = gids_ref[t]
            row0 = mids_ref[t] * tm
            grp_start = offs_ref[g]
            grp_end = offs_ref[g + 1]
            interior = (grp_start <= row0) & (grp_end >= row0 + tm)

            # Common case: whole m-tile belongs to this expert -> plain
            # full-lane store (no output read, no mask, no vst.msk).
            @pl.when(interior)
            def _():
                o_ref[...] = acc_ref[...].astype(o_ref.dtype)

            # Group-boundary tile: merge with what earlier work tiles already
            # wrote into this (resident) output block, using a (tm, 1) mask.
            # On the first visit of the block, substitute zeros so no stale
            # VMEM ever reaches the result.
            @pl.when(jnp.logical_not(interior))
            def _():
                rows = row0 + jax.lax.broadcasted_iota(jnp.int32, (tm, 1), 0)
                mask = (rows >= grp_start) & (rows < grp_end)
                first_visit = jnp.logical_or(
                    t == 0, mids_ref[t] != mids_ref[t_prev])
                prev = jnp.where(first_visit,
                                 jnp.zeros_like(acc_ref[...]),
                                 o_ref[...].astype(jnp.float32))
                o_ref[...] = jnp.where(mask, acc_ref[...], prev
                                       ).astype(o_ref.dtype)


def moe_fused_linear(x, weight, m_sizes, *, tm=None, tn=None, tk=None,
                     compute_dtype=jnp.bfloat16, out_dtype=None):
    """Grouped matmul: x [M,K] (rows sorted by expert), weight [E,N,K] or a
    PreparedWeight, m_sizes [E] -> y [M,N]. Assumes sum(m_sizes) == M."""
    M, K = x.shape
    if isinstance(weight, PreparedWeight):
        pw = weight
    else:
        pw = prepare_moe_weight(weight, tk=tk, tn=tn,
                                compute_dtype=compute_dtype)
    assert pw.in_features == K, "in_features mismatch"
    N = pw.out_features
    E, K_pad, N_pad = pw.w_kn.shape
    tk, tn = pw.tk, pw.tn
    compute_dtype = pw.w_kn.dtype
    out_dtype = x.dtype if out_dtype is None else out_dtype

    # ---- tile selection: tm multiple of 16 (bf16 sublane packing) ----
    if tm is None:
        tm = min(1024, _round_up(max(M, 1), 16))
    M_pad = _round_up(M, tm)
    tiles_m = M_pad // tm
    tiles_k = K_pad // tk
    tiles_n = N_pad // tn

    # ---- group metadata (scalar-prefetched into SMEM) ----
    sizes = m_sizes.astype(jnp.int32)
    ends = jnp.cumsum(sizes)
    starts = ends - sizes
    offsets = jnp.concatenate([jnp.zeros((1,), jnp.int32), ends]).astype(jnp.int32)

    first_tile = starts // tm
    last_tile = jnp.maximum(ends - 1, 0) // tm
    group_tiles = jnp.where(sizes == 0, 0, last_tile - first_tile + 1)
    work_cum = jnp.cumsum(group_tiles)                 # [E]
    work_start = work_cum - group_tiles
    total_work = jnp.maximum(work_cum[-1], 1)

    num_work_tiles = tiles_m + E - 1                   # static upper bound
    t_idx = jnp.arange(num_work_tiles, dtype=jnp.int32)
    t_eff = jnp.minimum(t_idx, total_work - 1)         # padding repeats last
    gids = jnp.sum((work_cum[None, :] <= t_eff[:, None]).astype(jnp.int32), axis=1)
    gids = jnp.minimum(gids, E - 1).astype(jnp.int32)
    mids = first_tile[gids] + (t_eff - work_start[gids])
    mids = jnp.clip(mids, 0, tiles_m - 1).astype(jnp.int32)

    # ---- input cast + pad (bf16 halves the x HBM traffic as well) ----
    xc = x.astype(compute_dtype)
    if (M_pad, K_pad) != (M, K):
        xc = jnp.pad(xc, ((0, M_pad - M), (0, K_pad - K)))

    # ---- index maps: duplicate (padded) work tiles reuse the previous
    #      step's block index so Pallas elides their DMAs entirely ----
    last_k = tiles_k - 1

    def _is_dup(t, gid, mid):
        tp = jnp.maximum(t - 1, 0)
        return (t > 0) & (gid[t] == gid[tp]) & (mid[t] == mid[tp])

    def x_map(n, t, k, offs, gid, mid):
        k_eff = jnp.where(_is_dup(t, gid, mid), last_k, k)
        return (mid[t], k_eff)

    def w_map(n, t, k, offs, gid, mid):
        k_eff = jnp.where(_is_dup(t, gid, mid), last_k, k)
        return (gid[t], k_eff, n)

    def o_map(n, t, k, offs, gid, mid):
        return (mid[t], n)

    grid = (tiles_n, num_work_tiles, tiles_k)

    grid_spec = pltpu.PrefetchScalarGridSpec(
        num_scalar_prefetch=3,
        grid=grid,
        in_specs=[
            pl.BlockSpec((tm, tk), x_map),
            pl.BlockSpec((pl.Squeezed(), tk, tn), w_map),
        ],
        out_specs=pl.BlockSpec((tm, tn), o_map),
        scratch_shapes=[pltpu.VMEM((tm, tn), jnp.float32)],
    )

    # ---- VMEM budget (double-buffered tiles + f32 acc), capped for v7x ----
    cdt_size = jnp.dtype(compute_dtype).itemsize
    out_size = jnp.dtype(out_dtype).itemsize
    est = (2 * tm * tk * cdt_size      # x double-buffer
           + 2 * tk * tn * cdt_size    # w double-buffer
           + 2 * tm * tn * out_size    # out double-buffer
           + tm * tn * 4)              # f32 accumulator
    vmem_limit = int(min(max(int(est * 1.25), 32 * 1024 * 1024),
                         48 * 1024 * 1024))

    cost = pl.CostEstimate(
        flops=int(2 * M * K * N),
        transcendentals=0,
        bytes_accessed=int(tiles_n * M_pad * K_pad * cdt_size
                           + num_work_tiles * K_pad * N_pad * cdt_size
                           + M_pad * N_pad * out_size),
    )

    out = pl.pallas_call(
        _moe_gmm_kernel,
        out_shape=jax.ShapeDtypeStruct((M_pad, N_pad), out_dtype),
        grid_spec=grid_spec,
        compiler_params=pltpu.CompilerParams(
            dimension_semantics=("parallel", "arbitrary", "arbitrary"),
            vmem_limit_bytes=vmem_limit),
        cost_estimate=cost,
    )(offsets, gids, mids, xc, pw.w_kn)

    return out[:M, :N]


def moe_fused_kaiming_uniform(key, num_experts, out_features, in_features,
                              dtype=jnp.float32):
    """Matches moe_fused_kaiming_uniform_: U(-b, b), b = sqrt(3*5/in_features)."""
    bound = math.sqrt(3.0 * 5.0 / in_features)
    return jax.random.uniform(
        key, (num_experts, out_features, in_features),
        dtype=dtype, minval=-bound, maxval=bound)


def _reference(x, weight, m_sizes, compute_dtype=jnp.bfloat16):
    # Same bf16 rounding of the operands as the kernel, f32 math.
    xq = np.asarray(jnp.asarray(x).astype(compute_dtype).astype(jnp.float32))
    wq = np.asarray(jnp.asarray(weight).astype(compute_dtype).astype(jnp.float32))
    offs = np.concatenate([[0], np.cumsum(np.asarray(m_sizes))])
    out = np.zeros((xq.shape[0], wq.shape[1]), np.float32)
    for e in range(wq.shape[0]):
        s, t = int(offs[e]), int(offs[e + 1])
        out[s:t] = xq[s:t] @ wq[e].T
    return out


if __name__ == "__main__":
    key = jax.random.PRNGKey(0)
    k1, k2, k3, k4 = jax.random.split(key, 4)

    # --- test 1: small single-tile case (module-consistent shapes),
    #             convenience path (weight relayout done inside the call).
    num_experts = 4
    in_features = 64
    out_features = 128
    m_sizes = jnp.array([8, 4, 12, 8], dtype=jnp.int32)       # sum = 32 tokens
    M = int(np.sum(np.asarray(m_sizes)))
    x = jax.random.normal(k1, (M, in_features), dtype=jnp.float32)
    weight = moe_fused_kaiming_uniform(k2, num_experts, out_features, in_features)

    y = jax.block_until_ready(moe_fused_linear(x, weight, m_sizes))
    np.testing.assert_allclose(np.asarray(y), _reference(x, weight, m_sizes),
                               rtol=2e-3, atol=2e-3)

    # --- test 2: multi-tile case exercising boundary-straddling m-tiles,
    #             an empty expert, multiple K/N tiles, duplicate-tile DMA
    #             elision, and the hoisted prepared-weight path.
    m_sizes2 = jnp.array([40, 0, 50, 30, 40], dtype=jnp.int32)  # sum = 160
    M2 = int(np.sum(np.asarray(m_sizes2)))
    x2 = jax.random.normal(k3, (M2, 256), dtype=jnp.float32)
    weight2 = moe_fused_kaiming_uniform(k4, 5, 256, 256)
    prepared2 = prepare_moe_weight(weight2, tk=128, tn=128)     # init-time relayout
    y2 = jax.block_until_ready(
        moe_fused_linear(x2, prepared2, m_sizes2, tm=32))
    np.testing.assert_allclose(np.asarray(y2), _reference(x2, weight2, m_sizes2),
                               rtol=2e-3, atol=2e-3)

    print("KERNEL_OK")
</pallas_src>

<mosaic_0001>
module attributes {stable_mosaic.version = 11 : i64} {
  func.func @_moe_gmm_kernel(%arg0: i32, %arg1: i32, %arg2: i32, %arg3: memref<5xi32, #tpu.memory_space<smem>>, %arg4: memref<4xi32, #tpu.memory_space<smem>>, %arg5: memref<4xi32, #tpu.memory_space<smem>>, %arg6: memref<32x128xbf16, #tpu.memory_space<vmem>>, %arg7: memref<1x128x128xbf16, #tpu.memory_space<vmem>>, %arg8: memref<32x128xf32, #tpu.memory_space<vmem>>, %arg9: memref<32x128xf32, #tpu.memory_space<vmem>>) attributes {dimension_semantics = [#tpu.dimension_semantics<parallel>, #tpu.dimension_semantics<arbitrary>, #tpu.dimension_semantics<arbitrary>], iteration_bounds = array<i64: 1, 4, 1>, scalar_prefetch = 3 : i64, scratch_operands = 1 : i64, tpu.core_type = #tpu.core_type<tc>, window_params = [{transform_indices = @transform_0, window_bounds = array<i64: 32, 128>}, {transform_indices = @transform_1, window_bounds = array<i64: 1, 128, 128>}, {transform_indices = @transform_2, window_bounds = array<i64: 32, 128>}]} {
    %c1_i32 = arith.constant 1 : i32
    %0 = arith.subi %arg1, %c1_i32 : i32
    %c0_i32 = arith.constant 0 : i32
    %1 = arith.maxsi %0, %c0_i32 : i32
    %c0_i32_0 = arith.constant 0 : i32
    %2 = arith.cmpi sgt, %arg1, %c0_i32_0 : i32
    %3 = arith.index_cast %arg1 : i32 to index
    %4 = memref.load %arg4[%3] : memref<4xi32, #tpu.memory_space<smem>>
    %5 = arith.index_cast %1 : i32 to index
    %6 = memref.load %arg4[%5] : memref<4xi32, #tpu.memory_space<smem>>
    %7 = arith.cmpi eq, %4, %6 : i32
    %8 = arith.andi %2, %7 : i1
    %9 = arith.index_cast %arg1 : i32 to index
    %10 = memref.load %arg5[%9] : memref<4xi32, #tpu.memory_space<smem>>
    %11 = arith.index_cast %1 : i32 to index
    %12 = memref.load %arg5[%11] : memref<4xi32, #tpu.memory_space<smem>>
    %13 = arith.cmpi eq, %10, %12 : i32
    %14 = arith.andi %8, %13 : i1
    %true = arith.constant true
    %15 = arith.xori %14, %true : i1
    %16 = arith.extui %15 : i1 to i32
    %c0_i32_1 = arith.constant 0 : i32
    %17 = arith.cmpi ne, %16, %c0_i32_1 : i32
    scf.if %17 {
      %c0_i32_2 = arith.constant 0 : i32
      %18 = arith.cmpi eq, %arg2, %c0_i32_2 : i32
      %19 = arith.extui %18 : i1 to i32
      %c0_i32_3 = arith.constant 0 : i32
      %20 = arith.cmpi ne, %19, %c0_i32_3 : i32
      scf.if %20 {
        %cst_14 = arith.constant 0.000000e+00 : f32
        %31 = vector.broadcast %cst_14 : f32 to vector<32x128xf32>
        %c0_15 = arith.constant 0 : index
        %c0_16 = arith.constant 0 : index
        %32 = vector.load %arg9[%c0_15, %c0_16] : memref<32x128xf32, #tpu.memory_space<vmem>>, vector<32x128xf32>
        tpu.vector_store %arg9[%c0_15, %c0_16], %31 {strides = array<i32>} : memref<32x128xf32, #tpu.memory_space<vmem>>, vector<32x128xf32>,
      } else {
      }
      %c0 = arith.constant 0 : index
      %c0_4 = arith.constant 0 : index
      %21 = vector.load %arg9[%c0, %c0_4] : memref<32x128xf32, #tpu.memory_space<vmem>>, vector<32x128xf32>
      %c0_5 = arith.constant 0 : index
      %c0_6 = arith.constant 0 : index
      %22 = vector.load %arg6[%c0_5, %c0_6] : memref<32x128xbf16, #tpu.memory_space<vmem>>, vector<32x128xbf16>
      %c0_7 = arith.constant 0 : index
      %c0_8 = arith.constant 0 : index
      %c0_9 = arith.constant 0 : index
      %23 = vector.load %arg7[%c0_7, %c0_8, %c0_9] : memref<1x128x128xbf16, #tpu.memory_space<vmem>>, vector<1x128x128xbf16>
      %24 = vector.shape_cast %23 : vector<1x128x128xbf16> to vector<128x128xbf16>
      %cst = arith.constant dense<0.000000e+00> : vector<32x128xf32>
      %25 = tpu.matmul %22, %24, %cst {dimension_numbers = #tpu.dot_dimension_numbers<[1], [0], [0], [1], [0, 0, 1, 1], [], []>} : vector<32x128xbf16>, vector<128x128xbf16>, vector<32x128xf32> -> vector<32x128xf32>
      %26 = arith.addf %21, %25 : vector<32x128xf32>
      %c0_10 = arith.constant 0 : index
      %c0_11 = arith.constant 0 : index
      %27 = vector.load %arg9[%c0_10, %c0_11] : memref<32x128xf32, #tpu.memory_space<vmem>>, vector<32x128xf32>
      tpu.vector_store %arg9[%c0_10, %c0_11], %26 {strides = array<i32>} : memref<32x128xf32, #tpu.memory_space<vmem>>, vector<32x128xf32>,
      %c0_i32_12 = arith.constant 0 : i32
      %28 = arith.cmpi eq, %arg2, %c0_i32_12 : i32
      %29 = arith.extui %28 : i1 to i32
      %c0_i32_13 = arith.constant 0 : i32
      %30 = arith.cmpi ne, %29, %c0_i32_13 : i32
      scf.if %30 {
        %31 = arith.index_cast %arg1 : i32 to index
        %32 = memref.load %arg4[%31] : memref<4xi32, #tpu.memory_space<smem>>
        %33 = arith.index_cast %arg1 : i32 to index
        %34 = memref.load %arg5[%33] : memref<4xi32, #tpu.memory_space<smem>>
        %c32_i32 = arith.constant 32 : i32
        %35 = arith.muli %34, %c32_i32 : i32
        %36 = arith.index_cast %32 : i32 to index
        %37 = memref.load %arg3[%36] : memref<5xi32, #tpu.memory_space<smem>>
        %c1_i32_14 = arith.constant 1 : i32
        %38 = arith.addi %32, %c1_i32_14 : i32
        %39 = arith.index_cast %38 : i32 to index
        %40 = memref.load %arg3[%39] : memref<5xi32, #tpu.memory_space<smem>>
        %41 = arith.cmpi sle, %37, %35 : i32
        %c32_i32_15 = arith.constant 32 : i32
        %42 = arith.addi %35, %c32_i32_15 : i32
        %43 = arith.cmpi sge, %40, %42 : i32
        %44 = arith.andi %41, %43 : i1
        %45 = arith.extui %44 : i1 to i32
        %c0_i32_16 = arith.constant 0 : i32
        %46 = arith.cmpi ne, %45, %c0_i32_16 : i32
        scf.if %46 {
          %c0_19 = arith.constant 0 : index
          %c0_20 = arith.constant 0 : index
          %50 = vector.load %arg9[%c0_19, %c0_20] : memref<32x128xf32, #tpu.memory_space<vmem>>, vector<32x128xf32>
          %c0_21 = arith.constant 0 : index
          %c0_22 = arith.constant 0 : index
          %51 = vector.load %arg8[%c0_21, %c0_22] : memref<32x128xf32, #tpu.memory_space<vmem>>, vector<32x128xf32>
          tpu.vector_store %arg8[%c0_21, %c0_22], %50 {strides = array<i32>} : memref<32x128xf32, #tpu.memory_space<vmem>>, vector<32x128xf32>,
        } else {
        }
        %true_17 = arith.constant true
        %47 = arith.xori %44, %true_17 : i1
        %48 = arith.extui %47 : i1 to i32
        %c0_i32_18 = arith.constant 0 : i32
        %49 = arith.cmpi ne, %48, %c0_i32_18 : i32
        scf.if %49 {
          %50 = tpu.iota {dimensions = array<i32: 0>} : vector<32x1xi32>
          %51 = vector.broadcast %35 : i32 to vector<32x1xi32>
          %52 = arith.addi %51, %50 : vector<32x1xi32>
          %53 = vector.broadcast %37 : i32 to vector<32x1xi32>
          %54 = arith.cmpi sge, %52, %53 : vector<32x1xi32>
          %55 = vector.broadcast %40 : i32 to vector<32x1xi32>
          %56 = arith.cmpi slt, %52, %55 : vector<32x1xi32>
          %57 = arith.andi %54, %56 : vector<32x1xi1>
          %c0_i32_19 = arith.constant 0 : i32
          %58 = arith.cmpi eq, %arg1, %c0_i32_19 : i32
          %59 = arith.index_cast %arg1 : i32 to index
          %60 = memref.load %arg5[%59] : memref<4xi32, #tpu.memory_space<smem>>
          %61 = arith.index_cast %1 : i32 to index
          %62 = memref.load %arg5[%61] : memref<4xi32, #tpu.memory_space<smem>>
          %63 = arith.cmpi ne, %60, %62 : i32
          %64 = arith.ori %58, %63 : i1
          %cst_20 = arith.constant 0.000000e+00 : f32
          %65 = vector.broadcast %cst_20 : f32 to vector<32x128xf32>
          %c0_21 = arith.constant 0 : index
          %c0_22 = arith.constant 0 : index
          %66 = vector.load %arg8[%c0_21, %c0_22] : memref<32x128xf32, #tpu.memory_space<vmem>>, vector<32x128xf32>
          %67 = arith.select %64, %65, %66 : vector<32x128xf32>
          %c0_23 = arith.constant 0 : index
          %c0_24 = arith.constant 0 : index
          %68 = vector.load %arg9[%c0_23, %c0_24] : memref<32x128xf32, #tpu.memory_space<vmem>>, vector<32x128xf32>
          %69 = vector.shape_cast %57 : vector<32x1xi1> to vector<32x1xi1>
          %70 = vector.broadcast %69 : vector<32x1xi1> to vector<32x128xi1>
          %71 = arith.select %70, %68, %67 : vector<32x128xi1>, vector<32x128xf32>
          %c0_25 = arith.constant 0 : index
          %c0_26 = arith.constant 0 : index
          %72 = vector.load %arg8[%c0_25, %c0_26] : memref<32x128xf32, #tpu.memory_space<vmem>>, vector<32x128xf32>
          tpu.vector_store %arg8[%c0_25, %c0_26], %71 {strides = array<i32>} : memref<32x128xf32, #tpu.memory_space<vmem>>, vector<32x128xf32>,
        } else {
        }
      } else {
      }
    } else {
    }
    return
  }
  func.func @transform_0(%arg0: i32, %arg1: i32, %arg2: i32, %arg3: memref<5xi32, #tpu.memory_space<smem>>, %arg4: memref<4xi32, #tpu.memory_space<smem>>, %arg5: memref<4xi32, #tpu.memory_space<smem>>) -> (i32, i32) {
    %c1_i32 = arith.constant 1 : i32
    %0 = arith.subi %arg1, %c1_i32 : i32
    %c0_i32 = arith.constant 0 : i32
    %1 = arith.maxsi %0, %c0_i32 : i32
    %c0_i32_0 = arith.constant 0 : i32
    %2 = arith.cmpi sgt, %arg1, %c0_i32_0 : i32
    %3 = arith.index_cast %arg1 : i32 to index
    %4 = memref.load %arg4[%3] : memref<4xi32, #tpu.memory_space<smem>>
    %5 = arith.index_cast %1 : i32 to index
    %6 = memref.load %arg4[%5] : memref<4xi32, #tpu.memory_space<smem>>
    %7 = arith.cmpi eq, %4, %6 : i32
    %8 = arith.andi %2, %7 : i1
    %9 = arith.index_cast %arg1 : i32 to index
    %10 = memref.load %arg5[%9] : memref<4xi32, #tpu.memory_space<smem>>
    %11 = arith.index_cast %1 : i32 to index
    %12 = memref.load %arg5[%11] : memref<4xi32, #tpu.memory_space<smem>>
    %13 = arith.cmpi eq, %10, %12 : i32
    %14 = arith.andi %8, %13 : i1
    %c0_i32_1 = arith.constant 0 : i32
    %15 = arith.select %14, %c0_i32_1, %arg2 : i32
    %16 = arith.index_cast %arg1 : i32 to index
    %17 = memref.load %arg5[%16] : memref<4xi32, #tpu.memory_space<smem>>
    %c0_i32_2 = arith.constant 0 : i32
    return %17, %15 : i32, i32
  }
  func.func @transform_1(%arg0: i32, %arg1: i32, %arg2: i32, %arg3: memref<5xi32, #tpu.memory_space<smem>>, %arg4: memref<4xi32, #tpu.memory_space<smem>>, %arg5: memref<4xi32, #tpu.memory_space<smem>>) -> (i32, i32, i32) {
    %c1_i32 = arith.constant 1 : i32
    %0 = arith.subi %arg1, %c1_i32 : i32
    %c0_i32 = arith.constant 0 : i32
    %1 = arith.maxsi %0, %c0_i32 : i32
    %c0_i32_0 = arith.constant 0 : i32
    %2 = arith.cmpi sgt, %arg1, %c0_i32_0 : i32
    %3 = arith.index_cast %arg1 : i32 to index
    %4 = memref.load %arg4[%3] : memref<4xi32, #tpu.memory_space<smem>>
    %5 = arith.index_cast %1 : i32 to index
    %6 = memref.load %arg4[%5] : memref<4xi32, #tpu.memory_space<smem>>
    %7 = arith.cmpi eq, %4, %6 : i32
    %8 = arith.andi %2, %7 : i1
    %9 = arith.index_cast %arg1 : i32 to index
    %10 = memref.load %arg5[%9] : memref<4xi32, #tpu.memory_space<smem>>
    %11 = arith.index_cast %1 : i32 to index
    %12 = memref.load %arg5[%11] : memref<4xi32, #tpu.memory_space<smem>>
    %13 = arith.cmpi eq, %10, %12 : i32
    %14 = arith.andi %8, %13 : i1
    %c0_i32_1 = arith.constant 0 : i32
    %15 = arith.select %14, %c0_i32_1, %arg2 : i32
    %16 = arith.index_cast %arg1 : i32 to index
    %17 = memref.load %arg4[%16] : memref<4xi32, #tpu.memory_space<smem>>
    %c0_i32_2 = arith.constant 0 : i32
    return %17, %15, %arg0 : i32, i32, i32
  }
  func.func @transform_2(%arg0: i32, %arg1: i32, %arg2: i32, %arg3: memref<5xi32, #tpu.memory_space<smem>>, %arg4: memref<4xi32, #tpu.memory_space<smem>>, %arg5: memref<4xi32, #tpu.memory_space<smem>>) -> (i32, i32) {
    %0 = arith.index_cast %arg1 : i32 to index
    %1 = memref.load %arg5[%0] : memref<4xi32, #tpu.memory_space<smem>>
    %c0_i32 = arith.constant 0 : i32
    return %1, %arg0 : i32, i32
  }
}

</mosaic_0001>

<bundles_post_ra>
// kernel: tpu_custom_call.1
= control target key start
LH: loop header
LB: loop body
LE: loop exit
PB: predicated region body
PF: predicated region fallthrough
CT: control target
= control target key end

     0   :  { %s1672_s0 = inlined_call_operand.hbm [shape: s32[5], index: 0, kind: input, shape index: {}]   ;;  %s1673_s3 = inlined_call_operand.hbm [shape: bf16[32,128], index: 3, kind: input, shape index: {}]   ;;  %s1674_s4 = inlined_call_operand.hbm [shape: bf16[4,128,128], index: 4, kind: input, shape index: {}]   ;;  %s1675_s5 = inlined_call_operand.hbm [shape: f32[32,128], index: 5, kind: output, shape index: {}]   ;;  %s1676_s1 = inlined_call_operand.vmem [shape: s32[4], index: 1, kind: input, shape index: {}]   ;;  %s1677_s2 = inlined_call_operand.vmem [shape: s32[4], index: 2, kind: input, shape index: {}]  }
   0x1   :  { %1686 = sst [smem:[#allocation27_spill]] %s1673_s3  ;;  %s984_s20 = scalar_lea.hbm %s1672_s0, 16 }
   0x2   :  { %p985_p0 = scmp.ne.s32.totalorder %s1672_s0, %s984_s20  ;;  %p988_p1 = scmp.lt.u32.totalorder %s984_s20, %s1672_s0 }
   0x4   :  { %p990_p2 = pnand %p988_p1, %p985_p0 }
   0x6   :  { %993 = shalt.err (!%p990_p2)  }
   0x7   :  { %s1216_s25 = smov [#allocation4]   ;;  %s12_s30 = sshll.u32 %s1676_s1, 4  ;;  %s13_s30 = int_to_ptr.vmem [resolvable:$true] %s12_s30 }
   0x8   :  { %11 = dma.hbm_to_smem %s1672_s0, 16, %s1216_s25, [#allocation3] }
   0x9   :  { %s16_s8 = sshll.u32 %s1677_s2, 4  ;;  %s994_s9 = scalar_lea.vmem %s13_s30, 16  ;;  %s17_s8 = int_to_ptr.vmem [resolvable:$true] %s16_s8 }
   0xa   :  { %p995_p3 = scmp.ne.s32.totalorder %s13_s30, %s994_s9  ;;  %p999_p4 = scmp.lt.s32.totalorder %s13_s30, %s13_s30 }
   0xb   :  { %p1000_p5 = scmp.lt.s32.totalorder %s994_s9, %s994_s9 }
   0xd   :  { %p1001_p6 = por %p1000_p5, %p999_p4 }
   0xf   :  { %p1002_p7 = pnand %p1001_p6, %p995_p3 }
  0x11   :  { %1005 = shalt.err (!%p1002_p7)  }
  0x12   :  { %s1217_s10 = smov [#allocation5]   ;;  %s1006_s0 = scalar_lea.vmem %s17_s8, 16 }
  0x13   :  { %15 = dma.vmem_to_smem %s13_s30, 16, %s1217_s10, [#allocation3] }
  0x14   :  { %p1007_p8 = scmp.ne.s32.totalorder %s17_s8, %s1006_s0  ;;  %p1011_p9 = scmp.lt.s32.totalorder %s17_s8, %s17_s8 }
  0x15   :  { %p1012_p10 = scmp.lt.s32.totalorder %s1006_s0, %s1006_s0 }
  0x17   :  { %p1013_p11 = por %p1012_p10, %p1011_p9 }
  0x19   :  { %p1014_p12 = pnand %p1013_p11, %p1007_p8 }
  0x1b   :  { %1017 = shalt.err (!%p1014_p12)  }
  0x1c   :  { %s1218_s1 = smov [#allocation6]  }
  0x1d   :  { %19 = dma.vmem_to_smem %s17_s8, 16, %s1218_s1, [#allocation3] }
  0x1e   :  { %1154 = dma.done.wait [#allocation3], 48 }
  0x1f   :  { %1155 = vsyncadd [#allocation3], 4294967248 }
  0x20   :  { %21 = sfence }
  0x21   :  { %22 = vsyncpa [#allocation8], 0 }
  0x22   :  { %24 = vsyncpa [#allocation8 + $0x1], 0 }
  0x23   :  { %25 = vsyncpa [#allocation11], 0 }
  0x24   :  { %27 = vsyncpa [#allocation11 + $0x1], 0 }
  0x25   :  { %28 = vsyncpa [#allocation9], 0 }
  0x26   :  { %30 = vsyncpa [#allocation9 + $0x1], 0  ;;  %s1274_s2 = smov 0   ;;  %s1276_s11 = smov 0  }
  0x27   :  { %s1278_s12 = smov 0   ;;  %s1280_s13 = smov 0  }
  0x28   :  { %s1282_s14 = smov 0   ;;  %s1284_s15 = smov 0  }
  0x29   :  { %s1286_s16 = smov 0   ;;  %s1288_s17 = smov 0  }
  0x2a   :  { %s1290_s18 = smov 0   ;;  %s1292_s19 = smov 0  }
  0x2b   :  { %s1294_s20 = smov 0   ;;  %s1296_s21 = smov 0  }
  0x2c LB: > { %1687 = sst [smem:[#allocation22_spill]] %s1178_s12  ;;  %s759_s22 = sadd.s32 4294967295, %s1214_s21   ;;  %s1214_s21 = sphi %s1296_s21, %s36_s21   ;;  %s1210_s20 = sphi %s1294_s20, %s1725_s20   ;;  %s1206_s19 = sphi %s1292_s19, %s1724_s19   ;;  %s1202_s18 = sphi %s1290_s18, %s1715_s18   ;;  %s1198_s17 = sphi %s1288_s17, %s1723_s17   ;;  %s1194_s16 = sphi %s1286_s16, %s1722_s16   ;;  %s1190_s15 = sphi %s1284_s15, %s1721_s15   ;;  %s1186_s14 = sphi %s1282_s14, %s1720_s14   ;;  %s1182_s13 = sphi %s1280_s13, %s1719_s13   ;;  %s1178_s12 = sphi %s1278_s12, %s1713_s12   ;;  %s1174_s11 = sphi %s1276_s11, %s1718_s11   ;;  %s1170_s2 = sphi %s1274_s2, %s1717_s2  }
  0x2d   : > { %1688 = sst [smem:[#allocation23_spill]] %s1202_s18  ;;  %s760_s23 = sadd.s32 4294967294, %s1214_s21  }
  0x2e   : > { %s51_s24 = sadd.s32 1, %s1210_s20  ;;  %s68_s25 = sld [smem:[#allocation6 + %s1210_s20]] }
  0x2f   : > { %p53_p13 = scmp.ge.s32.totalorder %s51_s24, 4  ;;  %s94_s26 = sadd.s32 1, %s1202_s18 }
  0x30   : > { %p101_p0 = scmp.ne.s32.totalorder %s1202_s18, %s1198_s17  ;;  %p1681_p1 = scmp.eq.s32.totalorder %s1214_s21, 0 }
  0x31   : > { %s1727_s24 = smov (%p53_p13, %s51_s24), 0  ;;  %p107_p3 = scmp.ne.s32.totalorder %s1198_s17, %s1194_s16 }
  0x32   : > { %1689 = sst [smem:[#allocation24_spill]] %s1727_s24  ;;  %p1344_p2 = por %p1681_p1, %p101_p0 }
  0x33   : > { %s83_s28 = sld [smem:[#allocation6 + %s1727_s24]]  ;;  %p1350_p4 = scmp.eq.s32.totalorder %s759_s22, 0 }
  0x34   : > { %s177_s30 = sld [smem:[#allocation6 + %s1210_s20]]  ;;  %s184_s8 = sadd.s32 1, %s1178_s12 }
  0x35   : > { %s178_s6 = sld [smem:[#allocation6 + %s1727_s24]]  ;;  %p1358_p5 = por %p1350_p4, %p107_p3 }
  0x36   : > { %p194_p6 = scmp.ne.s32.totalorder %s1178_s12, %s1174_s11  ;;  %p195_p7 = scmp.eq.s32.totalorder %s759_s22, 3 }
  0x37   : > { %s1692_s7 = scalar_select %p1358_p5, 1, 0 }
  0x38   : > { %p200_p8 = scmp.ne.s32.totalorder %s1174_s11, %s1170_s2  ;;  %p201_p9 = scmp.eq.s32.totalorder %s760_s23, 3 }
  0x39   : > { %p1367_p10 = por %p195_p7, %p194_p6  ;;  %s89_s10 = ssub.s32 %s68_s25, %s83_s28 }
  0x3a   : > { %p1371_p11 = por %p201_p9, %p200_p8  ;;  %p92_p12 = scmp.eq.s32.totalorder %s89_s10, 0 }
  0x3b   : > { %s1693_s9 = scalar_select %p1367_p10, 1, 0 }
  0x3c   : > { %s1694_s0 = scalar_select %p1371_p11, 1, 0 }
  0x3d   : > { %s179_s1 = ssub.s32 %s177_s30, %s178_s6  ;;  %p1680_p0 = scmp.lt.s32.totalorder %s1214_s21, 4 }
  0x3e   : > { %p182_p13 = scmp.eq.s32.totalorder %s179_s1, 0  ;;  %s221_s23 = sand.u32 1, %s1202_s18  }
  0x3f   : > { %s1377_s16 = scalar_select %p92_p12, %s1202_s18, %s94_s26  }
  0x40   : > { %s1380_s22 = scalar_select %p182_p13, %s1178_s12, %s184_s8  }
  0x41   : > { %1695 = sst [smem:[#allocation25_spill]] %s1377_s16  ;;  %p1387_p3 = pnand %p1680_p0, %p1344_p2 }
  0x42   : > { %1696 = sst [smem:[#allocation26_spill]] %s1380_s22  ;;  %s767_s28 = sshll.u32 %s221_s23, 4 }
  0x43   : > { %s829_s30 = scalar_select %p1344_p2, [#allocation6], [#allocation13] }
  0x44   : > { %s830_s6 = scalar_select %p1344_p2, %s1210_s20, 0 }
  0x45   : > { %s1729_s30 = smov (!%p1680_p0, %s829_s30), [#allocation16]  ;;  %s225_s26 = scalar_lea.vmem [#allocation7], %s767_s28 }
  0x46   : > { %s1731_s6 = smov (!%p1680_p0, %s830_s6), 0  ;;  %s248_s8 = sshll.u32 %s225_s26, 4  ;;  %s1400_s8 = int_to_ptr.vmem [resolvable:$true] %s248_s8 }
  0x47   : > { %s235_s10 = sld [smem:[%s1729_s30 + %s1731_s6]]  ;;  %p775_p6 = scmp.ge.s32.totalorder %s1214_s21, 1 }
  0x48   : > { %p295_p7 = scmp.lt.s32.totalorder %s1214_s21, 5  ;;  %s1409_s27 = sld [smem:[#allocation5 + %s1210_s20]] }
  0x49   : > { %s1699_s3 = sld [smem:[#allocation27_spill]]  ;;  %s1419_s30 = scalar_lea.sflag [#allocation8], %s221_s23 }
  0x4a   : > { %p1404_p8 = pnand %p775_p6, %p295_p7  ;;  %s1417_s28 = sld [smem:[#allocation5 + %s1727_s24]] }
  0x4b   : > { %p1020_p9 = pneg %p1387_p3 }
  0x4c   : > { %s1698_s1 = scalar_select %p1404_p8, 1, 0 }
  0x4d   : > { %s796_s16 = sshll.u32 %s235_s10, 8 }
  0x4f   : > { %s1414_s12 = scalar_lea.hbm %s1699_s3, %s796_s16  ;;  %s1023_s16 = scalar_lea.hbm %s1699_s3, 256 }
  0x50   : > { %s1018_s6 = scalar_lea.hbm %s1414_s12, 256  ;;  %p1024_p6 = scmp.lt.u32.totalorder %s1414_s12, %s1699_s3 }
  0x51   : > { %p1019_p2 = scmp.ne.s32.totalorder %s1414_s12, %s1018_s6  ;;  %p1025_p7 = scmp.lt.u32.totalorder %s1023_s16, %s1018_s6 }
  0x52   : > { %p1027_p1 = scmp.lt.u32.totalorder %s1018_s6, %s1414_s12 }
  0x53   : > { %p1021_p12 = pnand %p1020_p9, %p1019_p2  ;;  %p1026_p0 = por %p1025_p7, %p1024_p6 }
  0x55   : > { %p1022_p13 = pneg %p1021_p12  ;;  %p1028_p11 = por %p1027_p1, %p1026_p0 }
  0x57   : > { %p1029_p10 = pnand %p1028_p11, %p1022_p13 }
  0x59   : > { %1032 = shalt.err (!%p1029_p10)
}
  0x5a   : > { %s1033_s23 = scalar_lea.vmem %s1400_s8, 256  ;;  %s1219_s26 = smov [#allocation7]  }
  0x5b   : > { %p1034_p2 = scmp.ne.s32.totalorder %s1400_s8, %s1033_s23  ;;  %s1038_s18 = sshll.u32 %s1219_s26, 4  ;;  %s1039_s18 = int_to_ptr.vmem [resolvable:$false] %s1038_s18 }
  0x5c   : > { %s1040_s22 = scalar_lea.vmem %s1039_s18, 512  ;;  %p1041_p8 = scmp.lt.s32.totalorder %s1400_s8, %s1039_s18 }
  0x5d   : > { %p1036_p12 = pnand %p1034_p2, %p1020_p9  ;;  %p1042_p6 = scmp.lt.s32.totalorder %s1040_s22, %s1033_s23 }
  0x5f   : > { %p1037_p5 = pneg %p1036_p12  ;;  %p1043_p7 = por %p1042_p6, %p1041_p8 }
  0x61   : > { %p1044_p1 = pnand %p1043_p7, %p1037_p5 }
  0x63   : > { %1047 = shalt.err (!%p1044_p1)
}
  0x64   : > { %s1685_s6 = smov 64   ;;  %s1221_s16 = smov 4  }
  0x65   : > { %846 = dma.hbm_to_vmem [thread:$0]  (!%p1387_p3), %s1414_s12, 256, %s1400_s8, %s1419_s30, %s1685_s6, %s1685_s6, %s1221_s16  }
  0x66   : > { %p161_p5 = scmp.ne.s32.totalorder %s1190_s15, %s1186_s14  ;;  %p167_p10 = scmp.ne.s32.totalorder %s1186_s14, %s1182_s13 }
  0x67   : > { %p1700_p11 = scmp.eq.s32.totalorder %s1214_s21, 0  ;;  %s258_s10 = sand.u32 1, %s1190_s15  }
  0x68   : > { %p1459_p8 = por %p167_p10, %p1350_p4  ;;  %s147_s26 = ssub.s32 %s1409_s27, %s1417_s28 }
  0x69   : > { %p163_p0 = por %p161_p5, %p1700_p11  ;;  %s154_s18 = sadd.s32 1, %s1190_s15 }
  0x6a   : > { %p152_p9 = scmp.eq.s32.totalorder %s147_s26, 0  ;;  %s771_s22 = sshll.u32 %s258_s10, 6 }
  0x6b   : > { %s832_s25 = scalar_select %p163_p0, [#allocation5], [#allocation14] }
  0x6c   : > { %s1467_s3 = scalar_select %p152_p9, %s1190_s15, %s154_s18  }
  0x6d   : > { %s833_s24 = scalar_select %p163_p0, %s1210_s20, 0 }
  0x6e   : > { %p1702_p13 = scmp.lt.s32.totalorder %s1214_s21, 4  ;;  %s262_s29 = scalar_lea.vmem [#allocation10], %s771_s22 }
  0x6f   : > { %s287_s8 = sshll.u32 %s262_s29, 4  ;;  %s1487_s18 = scalar_lea.sflag [#allocation11], %s258_s10  ;;  %s1480_s8 = int_to_ptr.vmem [resolvable:$true] %s287_s8 }
  0x70   : > { %s1733_s25 = smov (!%p1702_p13, %s832_s25), [#allocation17]  ;;  %p1703_p3 = pmov %p1702_p13 }
  0x72   : > { %s1735_s24 = smov (!%p1703_p3, %s833_s24), 0  ;;  %p1704_p2 = pmov %p1703_p3 }
  0x73   : > { %s267_s13 = sld [smem:[%s1733_s25 + %s1735_s24]]  ;;  %s1053_s25 = scalar_lea.hbm %s1674_s4, 4096 }
  0x74   : > { %p1476_p12 = pnand %p1704_p2, %p163_p0 }
  0x76   : > { %p1050_p6 = pneg %p1476_p12 }
  0x79   : > { %s797_s27 = sshll.u32 %s267_s13, 10 }
  0x7a   : > { %s1485_s26 = scalar_lea.hbm %s1674_s4, %s797_s27 }
  0x7b   : > { %s1048_s6 = scalar_lea.hbm %s1485_s26, 1024  ;;  %p1054_p5 = scmp.lt.u32.totalorder %s1485_s26, %s1674_s4 }
  0x7c   : > { %p1049_p4 = scmp.ne.s32.totalorder %s1485_s26, %s1048_s6  ;;  %p1055_p10 = scmp.lt.u32.totalorder %s1053_s25, %s1048_s6 }
  0x7d   : > { %p1057_p0 = scmp.lt.u32.totalorder %s1048_s6, %s1485_s26 }
  0x7e   : > { %p1051_p7 = pnand %p1050_p6, %p1049_p4  ;;  %p1056_p11 = por %p1055_p10, %p1054_p5 }
  0x80   : > { %p1052_p1 = pneg %p1051_p7  ;;  %p1058_p9 = por %p1057_p0, %p1056_p11 }
  0x82   : > { %p1059_p13 = pnand %p1058_p9, %p1052_p1 }
  0x84   : > { %1062 = shalt.err (!%p1059_p13)
}
  0x85   : > { %s1063_s10 = scalar_lea.vmem %s1480_s8, 1024  ;;  %s1222_s27 = smov [#allocation10]  }
  0x86   : > { %p1064_p3 = scmp.ne.s32.totalorder %s1480_s8, %s1063_s10  ;;  %s1068_s28 = sshll.u32 %s1222_s27, 4  ;;  %s1069_s28 = int_to_ptr.vmem [resolvable:$false] %s1068_s28 }
  0x87   : > { %s1070_s30 = scalar_lea.vmem %s1069_s28, 2048  ;;  %p1071_p7 = scmp.lt.s32.totalorder %s1480_s8, %s1069_s28 }
  0x88   : > { %p1066_p2 = pnand %p1064_p3, %p1050_p6  ;;  %p1072_p5 = scmp.lt.s32.totalorder %s1070_s30, %s1063_s10 }
  0x8a   : > { %p1067_p4 = pneg %p1066_p2  ;;  %p1073_p10 = por %p1072_p5, %p1071_p7 }
  0x8c   : > { %p1074_p11 = pnand %p1073_p10, %p1067_p4 }
  0x8e   : > { %1077 = shalt.err (!%p1074_p11)
}
  0x8f   : > { %s1706_s6 = smov 64   ;;  %p1707_p6 = scmp.ne.s32.totalorder %s1698_s1, 0 }
  0x90   : > { %851 = dma.hbm_to_vmem [thread:$0]  (!%p1476_p12), %s1485_s26, 1024, %s1480_s8, %s1487_s18, %s1706_s6, %s1706_s6, %s1221_s16  }
  0x91   : > { %299 = sbr.rel (%p1707_p6) target bundleno = 475 (0x1db), region = 28  ;;  %s301_s24 = sand.u32 (!%p1707_p6), 1, %s1198_s17  }
  0x92   : > { %s1521_s22 = sshll.u32 (!%p1707_p6), %s301_s24, 4  ;;  %s302_s25 = scalar_lea.sflag (!%p1707_p6), [#allocation8], %s301_s24 }
  0x93   : > { %s305_s13 = scalar_lea.vmem (!%p1707_p6), [#allocation7], %s1521_s22  ;;  %p1708_p1 = scmp.ne.s32.totalorder (!%p1707_p6), %s1692_s7, 0 }
  0x98   : > { %1157 = dma.done.wait (%p1708_p1), %s302_s25, 256  }
  0x99   : > { %1159 = vsyncadd (%p1708_p1), %s302_s25, 4294967040  ;;  %s310_s12 = sand.u32 1, %s1186_s14  }
  0x9a   : > { %s777_s16 = sshll.u32 %s310_s12, 6  ;;  %s311_s8 = scalar_lea.sflag [#allocation11], %s310_s12 }
  0x9b   : > { %s1529_s1 = scalar_lea.vmem [#allocation10], %s777_s16 }
  0x9c   : > { %1161 = dma.done.wait (%p1459_p8), %s311_s8, 1024  }
  0x9d   : > { %1163 = vsyncadd (%p1459_p8), %s311_s8, 4294966272  ;;  %s779_s7 = sadd.s32 4294967295, %s1206_s19  ;;  %s379_s26 = sld [smem:[#allocation5 + %s1206_s19]] }
  0x9e   : > { %p376_p12 = scmp.gt.s32.totalorder %s779_s7, 0  ;;  %s337_s18 = sand.u32 1, %s1174_s11  }
  0x9f   : > { %s384_s29 = sld [smem:[#allocation6 + %s1206_s19]]  ;;  %s778_s10 = sshll.u32 %s337_s18, 5 }
  0xa0   : > { %s1737_s7 = smov (!%p376_p12, %s779_s7), 0  ;;  %p378_p8 = scmp.gt.s32.totalorder %s1206_s19, 0 }
  0xa1   : > { %s380_s27 = sld [smem:[#allocation5 + %s1737_s7]]  ;;  %s1546_s28 = scalar_lea.vmem [#allocation12], %s778_s10 }
  0xa2   : > { %s385_s23 = sld [smem:[#allocation6 + %s1737_s7]] }
  0xa7   : > { %p381_p0 = scmp.eq.s32.totalorder %s379_s26, %s380_s27 }
  0xa8   : > { %p386_p13 = scmp.eq.s32.totalorder %s384_s29, %s385_s23 }
  0xa9   : > { %p382_p9 = pnand %p381_p0, %p378_p8 }
  0xab   : > { %p383_p3 = pneg %p382_p9 }
  0xad   : > { %p387_p2 = pnand %p386_p13, %p383_p3 }
  0xae   : > { %v962_v0 = vld [vmem:[%s1529_s1] sm:$0xff] (%p387_p2)   ;;  %v963_v1 = vld [vmem:[%s1529_s1 + $0x8] sm:$0xff] (%p387_p2)   ;;  %v964_v2 = vld [vmem:[%s1529_s1 + $0x10] sm:$0xff] (%p387_p2)   ;;  %s544_s30 = sld [smem:[#allocation5 + %s1206_s19]] (%p387_p2) }
  0xaf   : > { %391 = sbr.rel (!%p387_p2) target bundleno = 448 (0x1c0), region = 40  ;;  %809 = vmatprep.subr.bf16.mxu0 (%p387_p2), %v962_v0  ;;  %v965_v3 = vld [vmem:[%s1529_s1 + $0x18] sm:$0xff] (%p387_p2)   ;;  %v970_v4 = vld [vmem:[%s305_s13] sm:$0xff] (%p387_p2)   ;;  %v967_v6 = vld [vmem:[%s1529_s1 + $0x28] sm:$0xff] (%p387_p2)   ;;  %s545_s6 = sld [smem:[#allocation6 + %s1206_s19]] (%p387_p2) }
  0xb0   : > { %810 = vmatpush3.bf16.msra.mxu0 (%p387_p2), %v962_v0  ;;  %825 = vmatprep.mubr.bf16.mxu0 (%p387_p2), %v970_v4  ;;  %v966_v5 = vld [vmem:[%s1529_s1 + $0x20] sm:$0xff] (%p387_p2)   ;;  %v968_v7 = vld [vmem:[%s1529_s1 + $0x30] sm:$0xff] (%p387_p2)   ;;  %v969_v8 = vld [vmem:[%s1529_s1 + $0x38] sm:$0xff] (%p387_p2)  }
  0xb1   : > { %811 = vmatprep.subr.bf16.mxu0 (%p387_p2), %v963_v1  ;;  %v971_v9 = vld [vmem:[%s305_s13 + $0x8] sm:$0xff] (%p387_p2)  }
  0xb4   : > { %812 = vmatpush3.bf16.msra.mxu0 (%p387_p2), %v963_v1  ;;  %s548_s24 = sadd.s32 (%p387_p2), 1, %s544_s30  ;;  %s1562_s25 = sld [smem:[#allocation4 + %s544_s30]] (%p387_p2) }
  0xb5   : > { %813 = vmatprep.subr.bf16.mxu0 (%p387_p2), %v964_v2  ;;  %s1564_s12 = sld [smem:[#allocation4 + %s548_s24]] (%p387_p2)  ;;  %s790_s16 = sshll.u32 (%p387_p2), %s545_s6, 5 }
  0xb6   : > { %s551_s8 = sadd.s32 32, %s790_s16 }
  0xb8   : > { %814 = vmatpush3.bf16.msra.mxu0 %v964_v2 }
  0xb9   : > { %815 = vmatprep.subr.bf16.mxu0 %v965_v3 }
  0xba   : > { %p550_p4 = scmp.le.s32.totalorder %s1562_s25, %s790_s16 }
  0xbb   : > { %p552_p7 = scmp.ge.s32.totalorder %s1564_s12, %s551_s8 }
  0xbc   : > { %816 = vmatpush3.bf16.msra.mxu0 %v965_v3 }
  0xbd   : > { %817 = vmatprep.subr.bf16.mxu0 %v966_v5  ;;  %p1568_p5 = pnand %p552_p7, %p550_p4 }
  0xc0   : > { %818 = vmatpush3.bf16.msra.mxu0 %v966_v5 }
  0xc1   : > { %819 = vmatprep.subr.bf16.mxu0 %v967_v6 }
  0xc4   : > { %820 = vmatpush3.bf16.msra.mxu0 %v967_v6 }
  0xc5   : > { %821 = vmatprep.subr.bf16.mxu0 %v968_v7 }
  0xc8   : > { %822 = vmatpush3.bf16.msra.mxu0 %v968_v7 }
  0xc9   : > { %823 = vmatprep.subr.bf16.mxu0 %v969_v8 }
  0xcc   : > { %824 = vmatpush3.bf16.msra.mxu0 %v969_v8 }
  0xcf   : > { %826 = vmatmul.mubr.bf16.vlgmr.msra.gmra.mrb[0].mxu0 %v971_v9 }
 0x1a0   : > { %556 = sbr.rel (%p1568_p5) target bundleno = 431 (0x1af), region = 52 }
 0x1a2   : > { %v827_v10 = vpop.f32.mrb[0].mxu0 }
 0x1a3   : > { %v518_v11 = vpop.f32.mrb[1].mxu0  ;;  %539 = vst [vmem:[#allocation2 + $0x10] sm:$0xff] %v827_v10 }
 0x1a4   : > { %v828_v12 = vpop.f32.mrb[2].mxu0  ;;  %537 = vst [vmem:[#allocation2] sm:$0xff] %v518_v11 }
 0x1a5   : > { %v521_v13 = vpop.f32.mrb[3].mxu0  ;;  %540 = vst [vmem:[#allocation2 + $0x18] sm:$0xff] %v828_v12 }
 0x1a6   : > { %538 = vst [vmem:[#allocation2 + $0x8] sm:$0xff] %v521_v13 }
 0x1aa   : > { %v559_v16 = vld [vmem:[#allocation2 + $0x10] sm:$0xff] }
 0x1ab   : > { %v557_v14 = vld [vmem:[#allocation2] sm:$0xff]  ;;  %563 = vst [vmem:[%s1546_s28 + $0x10] sm:$0xff] %v559_v16 }
 0x1ac   : > { %561 = vst [vmem:[%s1546_s28] sm:$0xff] %v557_v14  ;;  %v560_v17 = vld [vmem:[#allocation2 + $0x18] sm:$0xff] }
 0x1ad   : > { %v558_v15 = vld [vmem:[#allocation2 + $0x8] sm:$0xff]  ;;  %564 = vst [vmem:[%s1546_s28 + $0x18] sm:$0xff] %v560_v17 }
 0x1ae   : > { %562 = vst [vmem:[%s1546_s28 + $0x8] sm:$0xff] %v558_v15 }
 0x1af PF: > { %567 = sbr.rel (!%p1568_p5) target bundleno = 448 (0x1c0), region = 56  ;;  %v568_v18 = vlaneseq (%p1568_p5)  ;;  %s593_s22 = sld [smem:[#allocation6 + %s1206_s19]] (%p1568_p5)  ;;  %v573_v20 = vstv (%p1568_p5), %s790_s16  ;;  %v578_v25 = vstv (%p1568_p5), %s1562_s25  ;;  %v583_v26 = vstv (%p1568_p5), %s1564_s12 }
 0x1b0   : > { %s594_s13 = sld [smem:[#allocation6 + %s1737_s7]] (%p1568_p5)  ;;  %p592_p10 = scmp.eq.s32.totalorder (%p1568_p5), %s1206_s19, 0 }
 0x1b1   : > { %v569_v19 = vshrl.u32 (%p1568_p5), %v568_v18, 7 }
 0x1b2   : > { %v610_v33 = vld [vmem:[#allocation2 + $0x10] sm:$0xff] (%p1568_p5) }
 0x1b3   : > { %v570_v21 = vadd.s32 (%p1568_p5), 8, %v569_v19  ;;  %v571_v22 = vadd.s32 (%p1568_p5), 16, %v569_v19  ;;  %v572_v23 = vadd.s32 (%p1568_p5), 24, %v569_v19  ;;  %v574_v24 = vadd.s32 (%p1568_p5), %v573_v20, %v569_v19  ;;  %v608_v30 = vld [vmem:[#allocation2] sm:$0xff] (%p1568_p5) }
 0x1b4   : > { %v611_v36 = vld [vmem:[#allocation2 + $0x18] sm:$0xff] (%p1568_p5) }
 0x1b5   : > { %v575_v27 = vadd.s32 (%p1568_p5), %v573_v20, %v570_v21  ;;  %v576_v28 = vadd.s32 (%p1568_p5), %v573_v20, %v571_v22  ;;  %v577_v29 = vadd.s32 (%p1568_p5), %v573_v20, %v572_v23  ;;  %vm579_vm0 = vcmp.ge.s32.totalorder (%p1568_p5), %v574_v24, %v578_v25  ;;  %v609_v31 = vld [vmem:[#allocation2 + $0x8] sm:$0xff] (%p1568_p5) }
 0x1b6   : > { %p595_p11 = scmp.ne.s32.totalorder %s593_s22, %s594_s13  ;;  %vm584_vm1 = vcmp.lt.s32.totalorder %v574_v24, %v583_v26 }
 0x1b7   : > { %vm580_vm2 = vcmp.ge.s32.totalorder %v575_v27, %v578_v25  ;;  %vm585_vm3 = vcmp.lt.s32.totalorder %v575_v27, %v583_v26  ;;  %vm581_vm4 = vcmp.ge.s32.totalorder %v576_v28, %v578_v25  ;;  %vm586_vm5 = vcmp.lt.s32.totalorder %v576_v28, %v583_v26  ;;  %vm588_vm6 = vmand %vm579_vm0, %vm584_vm1 }
 0x1b8   : > { %p596_p6 = por %p595_p11, %p592_p10  ;;  %vm582_vm7 = vcmp.ge.s32.totalorder %v577_v29, %v578_v25  ;;  %vm587_vm8 = vcmp.lt.s32.totalorder %v577_v29, %v583_v26  ;;  %vm589_vm9 = vmand %vm580_vm2, %vm585_vm3 }
 0x1b9   : > { %vm590_vm10 = vmand %vm581_vm4, %vm586_vm5 }
 0x1ba   : > { %s973_s7 = scalar_select %p596_p6, 0, 255  ;;  %vm591_vm11 = vmand %vm582_vm7, %vm587_vm8 }
 0x1bc   : > { %v974_v32 = vld [vmem:[%s1546_s28] sm:%s973_s7]  ;;  %v977_v35 = vld [vmem:[%s1546_s28 + $0x8] sm:%s973_s7] }
 0x1bd   : > { %v620_v34 = vsel %vm588_vm6, %v608_v30, %v974_v32  ;;  %v621_v37 = vsel %vm589_vm9, %v609_v31, %v977_v35  ;;  %v980_v38 = vld [vmem:[%s1546_s28 + $0x10] sm:%s973_s7]  ;;  %v983_v40 = vld [vmem:[%s1546_s28 + $0x18] sm:%s973_s7] }
 0x1be   : > { %624 = vst [vmem:[%s1546_s28] sm:$0xff] %v620_v34  ;;  %625 = vst [vmem:[%s1546_s28 + $0x8] sm:$0xff] %v621_v37  ;;  %v622_v39 = vsel %vm590_vm10, %v610_v33, %v980_v38  ;;  %v623_v41 = vsel %vm591_vm11, %v611_v36, %v983_v40 }
 0x1bf   : > { %626 = vst [vmem:[%s1546_s28 + $0x10] sm:$0xff] %v622_v39  ;;  %627 = vst [vmem:[%s1546_s28 + $0x18] sm:$0xff] %v623_v41 }
 0x1c0 PF: > { %p1710_p1 = scmp.ne.s32.totalorder %s1693_s9, 0  ;;  %s644_s10 = sshll.u32 %s1546_s28, 4  ;;  %s1599_s10 = int_to_ptr.vmem [resolvable:$true] %s644_s10 }
 0x1c1   : > { %s1608_s24 = scalar_lea.sflag [#allocation9], %s337_s18  ;;  %s1078_s25 = scalar_lea.vmem %s1599_s10, 512 }
 0x1c2   : > { %s837_s26 = scalar_select %p1710_p1, [#allocation6], [#allocation15] }
 0x1c3   : > { %s1739_s19 = smov (!%p1710_p1, %s1206_s19), 0  ;;  %p1079_p12 = scmp.ne.s32.totalorder %s1599_s10, %s1078_s25 }
 0x1c4   : > { %s636_s29 = sld [smem:[%s837_s26 + %s1739_s19]]  ;;  %s1223_s19 = smov [#allocation12]  }
 0x1c5   : > { %p1080_p8 = pnand %p1079_p12, %p1710_p1  ;;  %s1082_s28 = sshll.u32 %s1223_s19, 4  ;;  %s1083_s28 = int_to_ptr.vmem [resolvable:$false] %s1082_s28 }
 0x1c6   : > { %s1084_s12 = scalar_lea.vmem %s1083_s28, 1024  ;;  %p1085_p9 = scmp.lt.s32.totalorder %s1599_s10, %s1083_s28 }
 0x1c7   : > { %p1081_p0 = pneg %p1080_p8  ;;  %p1086_p13 = scmp.lt.s32.totalorder %s1084_s12, %s1078_s25 }
 0x1c9   : > { %p1087_p3 = por %p1086_p13, %p1085_p9 }
 0x1ca   : > { %s798_s27 = sshll.u32 %s636_s29, 9 }
 0x1cb   : > { %s1604_s6 = scalar_lea.hbm %s1675_s5, %s798_s27  ;;  %p1088_p2 = pnand %p1087_p3, %p1081_p0 }
 0x1cd   : > { %1091 = shalt.err (!%p1088_p2)
}
 0x1ce   : > { %s1092_s18 = scalar_lea.hbm %s1604_s6, 512  ;;  %s1096_s1 = scalar_lea.hbm %s1675_s5, 512 }
 0x1cf   : > { %p1093_p4 = scmp.ne.s32.totalorder %s1604_s6, %s1092_s18  ;;  %p1097_p10 = scmp.lt.u32.totalorder %s1604_s6, %s1675_s5 }
 0x1d0   : > { %p1098_p11 = scmp.lt.u32.totalorder %s1096_s1, %s1092_s18  ;;  %p1100_p12 = scmp.lt.u32.totalorder %s1092_s18, %s1604_s6 }
 0x1d1   : > { %p1094_p7 = pnand %p1093_p4, %p1710_p1 }
 0x1d2   : > { %p1099_p6 = por %p1098_p11, %p1097_p10 }
 0x1d3   : > { %p1095_p5 = pneg %p1094_p7 }
 0x1d4   : > { %p1101_p8 = por %p1100_p12, %p1099_p6 }
 0x1d6   : > { %p1102_p0 = pnand %p1101_p8, %p1095_p5 }
 0x1d8   : > { %1105 = shalt.err (!%p1102_p0)
}
 0x1d9   : > { %s1224_s7 = smov 128   ;;  %s1225_s26 = smov 8  }
 0x1da   : > { %839 = dma.vmem_to_hbm [thread:$0]  (%p1710_p1), %s1599_s10, 512, %s1604_s6, %s1608_s24, %s1224_s7, %s1224_s7, %s1225_s26  }
 0x1db PF: > { %p857_p9 = scmp.ge.s32.totalorder %s1214_s21, 2  ;;  %s659_s29 = sand.u32 1, %s1170_s2  }
 0x1dc   : > { %p1711_p13 = scmp.ne.s32.totalorder %s1694_s0, 0  ;;  %s660_s27 = scalar_lea.sflag [#allocation9], %s659_s29 }
 0x1de   : > { %p853_p3 = pnand %p857_p9, %p1711_p13 }
 0x1e0   : > { %1165 = dma.done.wait (!%p853_p3), %s660_s27, 512  }
 0x1e1   : > { %1167 = vsyncadd (!%p853_p3), %s660_s27, 4294966784  ;;  %s36_s21 = sadd.s32 1, %s1214_s21   ;;  %s1712_s23 = sld [smem:[#allocation22_spill]] }
 0x1e2   : > { %p33_p2 = scmp.ge.s32.totalorder %s36_s21, 6   ;;  %s1713_s12 = sld [smem:[#allocation26_spill]] }
 0x1e3   : > { %s1714_s9 = sld [smem:[#allocation23_spill]]  ;;  %s1715_s18 = sld [smem:[#allocation25_spill]] }
 0x1e4   : > { %s1716_s10 = sld [smem:[#allocation24_spill]]  ;;  %s1717_s2 = smov %s1174_s11 }
 0x1e5   : > { %s1719_s13 = smov %s1186_s14  ;;  %s1720_s14 = smov %s1190_s15 }
 0x1e6   : > { %s1721_s15 = smov %s1467_s3  ;;  %s1722_s16 = smov %s1198_s17 }
 0x1e7   : > { %s1718_s11 = smov %s1712_s23  ;;  %s1724_s19 = smov %s1210_s20 }
 0x1e8   :  { %35 = sbr.rel (!%p33_p2) target bundleno = 44 (0x2c), region = 106 }
 0x1e9   : > { %s1723_s17 = smov %s1714_s9 }
 0x1ea   : > { %s1725_s20 = smov %s1716_s10 }
 0x1ef   :  { %665 = vsyncpa [#allocation8], 1 }
 0x1f0   :  { %667 = vsyncpa [#allocation8 + $0x1], 1 }
 0x1f1   :  { %668 = vsyncpa [#allocation11], 1 }
 0x1f2   :  { %670 = vsyncpa [#allocation11 + $0x1], 1 }
 0x1f3   :  { %671 = vsyncpa [#allocation9], 1 }
 0x1f4   :  { %673 = vsyncpa [#allocation9 + $0x1], 1 }

</bundles_post_ra>
